<compile_context>
chip_gen: v5e
topology: v5e:2x2
jax: 0.10.0
libtpu: 0.0.40
codegen_flags: <defaults>
</compile_context>

<pallas_src>
import functools

import jax
import jax.numpy as jnp
from jax.experimental import pallas as pl
from jax.experimental.pallas import tpu as pltpu

SMOOTH = 1.0
NUM_CLASSES = 3
_LANES = 128
_SUBLANES = 8
_ALIGN = _SUBLANES * _LANES          # 1024 samples = one (8,128) f32 tile


def _round_up(x, m):
    return (x + m - 1) // m * m


def _dice_loss_kernel(logits_ref, target_ref, partial_ref, *,
                      n_valid, tile_rows, num_classes, smooth):
    """One grid step processes tile_rows*128 samples.

    logits_ref:  (C, tile_rows, 128) native-dtype logits (class-major, lane-dense)
    target_ref:  (tile_rows, 128)    int32 class ids
    partial_ref: (1, 8, 128)         f32 per-(sublane,lane) partial loss sums
    """
    tile_n = tile_rows * _LANES
    tgt = target_ref[...]

    # Softmax over the C=3 classes, fully unrolled: the class reduction is a couple of
    # dense VPU max/add ops over (tile_rows, 128) vregs (no XLU, no MXU).
    xs = [logits_ref[i].astype(jnp.float32) for i in range(num_classes)]
    m = xs[0]
    for xi in xs[1:]:
        m = jnp.maximum(m, xi)
    es = [jnp.exp(xi - m) for xi in xs]
    s = es[0]
    for ei in es[1:]:
        s = s + ei
    inv_s = pl.reciprocal(s, approx=True)            # EUP slot, effectively free

    # Per-class dice with one-hot t (t^2 == t, p*t selected instead of multiplied):
    #   num = p + smooth            if t else smooth
    #   den = p^2 + (smooth + 1)    if t else p^2 + smooth
    # Accumulate num/den and subtract from C once at the end.
    acc = None
    for i in range(num_classes):
        p_i = es[i] * inv_s
        is_t = tgt == i
        num = jnp.where(is_t, p_i + smooth, smooth)
        den = p_i * p_i + jnp.where(is_t, smooth + 1.0, smooth)
        term = num * pl.reciprocal(den, approx=True)  # EUP again
        acc = term if acc is None else acc + term
    loss = float(num_classes) - acc                   # (tile_rows, 128) f32

    def write_partial(vals):
        # (tile_rows,128)->(tile_rows//8,8,128) is layout-preserving; the axis-0 sum is
        # plain vreg-wise VPU adds, leaving a lane-dense (1,8,128) partial (XLU idle).
        partial_ref[...] = vals.reshape(
            tile_rows // _SUBLANES, _SUBLANES, _LANES).sum(axis=0)[None]

    # Only the (at most one) ragged tile builds the iotas / mask; full tiles skip it.
    start = pl.program_id(0) * tile_n
    needs_mask = start + tile_n > n_valid

    @pl.when(needs_mask)
    def _():
        row = jax.lax.broadcasted_iota(jnp.int32, (tile_rows, _LANES), 0)
        lane = jax.lax.broadcasted_iota(jnp.int32, (tile_rows, _LANES), 1)
        gidx = start + row * _LANES + lane
        # Keep this a select (not a multiply): implicitly padded lanes of the ragged
        # block hold unspecified values that may be inf/NaN.
        write_partial(jnp.where(gidx < n_valid, loss, 0.0))

    @pl.when(jnp.logical_not(needs_mask))
    def _():
        write_partial(loss)


def dice_loss(predict, target, *, smooth=SMOOTH, num_classes=NUM_CLASSES,
              max_tile_rows=512):
    """predict: [N, C] logits (f32 or bf16); target: [N] integer class ids."""
    n, c = predict.shape
    assert c == num_classes

    # --- layout plumbing: class-major, lane-dense --------------------------------
    # The [N,C]->[C,N] transpose is the one unavoidable layout pass for this input
    # contract; the (small, <=1023-sample) pad and the reshape fuse into it.
    # TODO(synk): if the upstream producer can emit class-major [C, N] (and/or int8
    # targets) directly, pass them straight through and delete this block.
    n_pad = _round_up(n, _ALIGN)
    n_rows = n_pad // _LANES                          # multiple of 8
    logits_cm = jnp.transpose(predict)                # (C, N), native dtype
    if n_pad != n:
        logits_cm = jnp.pad(logits_cm, ((0, 0), (0, n_pad - n)))
    logits3 = logits_cm.reshape(num_classes, n_rows, _LANES)

    tgt = target if target.dtype == jnp.int32 else target.astype(jnp.int32)
    if n_pad != n:
        tgt = jnp.pad(tgt, (0, n_pad - n))
    target2 = tgt.reshape(n_rows, _LANES)

    # --- tiling -------------------------------------------------------------------
    tile_rows = min(max_tile_rows, n_rows)
    if n_rows > _SUBLANES and pl.cdiv(n_rows, tile_rows) < 2:
        # >=2 grid steps when there is enough work so both v7x TensorCores get a share
        tile_rows = _round_up(-(-n_rows // 2), _SUBLANES)
    tile_rows = _round_up(tile_rows, _SUBLANES)
    num_tiles = pl.cdiv(n_rows, tile_rows)

    kernel = functools.partial(_dice_loss_kernel, n_valid=n, tile_rows=tile_rows,
                               num_classes=num_classes, smooth=float(smooth))
    partials = pl.pallas_call(
        kernel,
        out_shape=jax.ShapeDtypeStruct((num_tiles, _SUBLANES, _LANES), jnp.float32),
        grid_spec=pltpu.PrefetchScalarGridSpec(
            num_scalar_prefetch=0,
            grid=(num_tiles,),
            in_specs=[
                pl.BlockSpec((num_classes, tile_rows, _LANES), lambda i: (0, i, 0)),
                pl.BlockSpec((tile_rows, _LANES), lambda i: (i, 0)),
            ],
            out_specs=pl.BlockSpec((1, _SUBLANES, _LANES), lambda i: (i, 0, 0)),
        ),
        compiler_params=pltpu.CompilerParams(
            dimension_semantics=("parallel",),
        ),
    )(logits3, target2)

    # Lane-dense final reduction + normalization: sum(loss) / (N*C) equals the PyTorch
    # "mean over N per class, summed over classes, / C".
    return jnp.sum(partials) / (n * num_classes)


def _dice_loss_ref(predict, target, *, smooth=SMOOTH, num_classes=NUM_CLASSES):
    # Pure-JAX reference mirroring the PyTorch code path exactly.
    t = jax.nn.one_hot(target, num_classes, dtype=jnp.float32)      # (N, C)
    p = jax.nn.softmax(predict.astype(jnp.float32), axis=1)         # (N, C)
    total = 0.0
    for i in range(num_classes):
        pi = p[:, i][:, None]
        ti = t[:, i][:, None]
        num = jnp.sum(pi * ti, axis=1) + smooth
        den = jnp.sum(pi ** 2 + ti ** 2, axis=1) + smooth
        total = total + jnp.mean(1.0 - num / den)
    return total / num_classes


if __name__ == "__main__":
    key = jax.random.PRNGKey(0)
    k1, k2, k3, k4 = jax.random.split(key, 4)

    # Small shape matching the module's call pattern (N samples, 3 classes).
    N = 8
    predict = jax.random.normal(k1, (N, NUM_CLASSES), dtype=jnp.float32)
    target = jax.random.randint(k2, (N,), 0, NUM_CLASSES, dtype=jnp.int32)

    out = jax.block_until_ready(dice_loss(predict, target))
    ref = jax.block_until_ready(_dice_loss_ref(predict, target))
    # approx reciprocals on the EUP -> slightly looser tolerance than exact divide
    assert jnp.allclose(out, ref, atol=5e-3, rtol=5e-3), (out, ref)

    # Multi-tile + ragged/masked path (N not a multiple of the tile size).
    N2 = 3000
    predict2 = jax.random.normal(k3, (N2, NUM_CLASSES), dtype=jnp.float32)
    target2 = jax.random.randint(k4, (N2,), 0, NUM_CLASSES, dtype=jnp.int32)
    ref2 = jax.block_until_ready(_dice_loss_ref(predict2, target2))

    out2a = jax.block_until_ready(dice_loss(predict2, target2, max_tile_rows=8))
    assert jnp.allclose(out2a, ref2, atol=5e-3, rtol=5e-3), (out2a, ref2)

    out2b = jax.block_until_ready(dice_loss(predict2, target2))   # default tiling
    assert jnp.allclose(out2b, ref2, atol=5e-3, rtol=5e-3), (out2b, ref2)

    print("KERNEL_OK")
</pallas_src>

<mosaic_0001>
module attributes {stable_mosaic.version = 11 : i64} {
  func.func @_dice_loss_kernel(%arg0: i32, %arg1: memref<3x8x128xf32, #tpu.memory_space<vmem>>, %arg2: memref<8x128xi32, #tpu.memory_space<vmem>>, %arg3: memref<1x8x128xf32, #tpu.memory_space<vmem>>) attributes {dimension_semantics = [#tpu.dimension_semantics<parallel>], iteration_bounds = array<i64: 1>, scalar_prefetch = 0 : i64, scratch_operands = 0 : i64, tpu.core_type = #tpu.core_type<tc>, window_params = [{transform_indices = @transform_0, window_bounds = array<i64: 3, 8, 128>}, {transform_indices = @transform_1, window_bounds = array<i64: 8, 128>}, {transform_indices = @transform_2, window_bounds = array<i64: 1, 8, 128>}]} {
    %c0 = arith.constant 0 : index
    %c0_0 = arith.constant 0 : index
    %0 = vector.load %arg2[%c0, %c0_0] : memref<8x128xi32, #tpu.memory_space<vmem>>, vector<8x128xi32>
    %c0_1 = arith.constant 0 : index
    %c0_2 = arith.constant 0 : index
    %c0_3 = arith.constant 0 : index
    %1 = vector.load %arg1[%c0_1, %c0_2, %c0_3] : memref<3x8x128xf32, #tpu.memory_space<vmem>>, vector<1x8x128xf32>
    %2 = vector.shape_cast %1 : vector<1x8x128xf32> to vector<8x128xf32>
    %c1 = arith.constant 1 : index
    %c0_4 = arith.constant 0 : index
    %c0_5 = arith.constant 0 : index
    %3 = vector.load %arg1[%c1, %c0_4, %c0_5] : memref<3x8x128xf32, #tpu.memory_space<vmem>>, vector<1x8x128xf32>
    %4 = vector.shape_cast %3 : vector<1x8x128xf32> to vector<8x128xf32>
    %c2 = arith.constant 2 : index
    %c0_6 = arith.constant 0 : index
    %c0_7 = arith.constant 0 : index
    %5 = vector.load %arg1[%c2, %c0_6, %c0_7] : memref<3x8x128xf32, #tpu.memory_space<vmem>>, vector<1x8x128xf32>
    %6 = vector.shape_cast %5 : vector<1x8x128xf32> to vector<8x128xf32>
    %7 = arith.maximumf %2, %4 : vector<8x128xf32>
    %8 = arith.maximumf %7, %6 : vector<8x128xf32>
    %9 = arith.subf %2, %8 : vector<8x128xf32>
    %10 = math.exp %9 : vector<8x128xf32>
    %11 = arith.subf %4, %8 : vector<8x128xf32>
    %12 = math.exp %11 : vector<8x128xf32>
    %13 = arith.subf %6, %8 : vector<8x128xf32>
    %14 = math.exp %13 : vector<8x128xf32>
    %15 = arith.addf %10, %12 : vector<8x128xf32>
    %16 = arith.addf %15, %14 : vector<8x128xf32>
    %17 = tpu.reciprocal %16 {approx = true} : vector<8x128xf32> -> vector<8x128xf32>
    %18 = arith.mulf %10, %17 : vector<8x128xf32>
    %c0_i32 = arith.constant 0 : i32
    %19 = vector.broadcast %c0_i32 : i32 to vector<8x128xi32>
    %20 = arith.cmpi eq, %0, %19 : vector<8x128xi32>
    %cst = arith.constant 1.000000e+00 : f32
    %21 = vector.broadcast %cst : f32 to vector<8x128xf32>
    %22 = arith.addf %18, %21 : vector<8x128xf32>
    %cst_8 = arith.constant 1.000000e+00 : f32
    %23 = vector.broadcast %cst_8 : f32 to vector<8x128xf32>
    %24 = arith.select %20, %22, %23 : vector<8x128xi1>, vector<8x128xf32>
    %25 = arith.mulf %18, %18 : vector<8x128xf32>
    %cst_9 = arith.constant 2.000000e+00 : f32
    %cst_10 = arith.constant 1.000000e+00 : f32
    %26 = vector.broadcast %cst_9 : f32 to vector<8x128xf32>
    %27 = vector.broadcast %cst_10 : f32 to vector<8x128xf32>
    %28 = arith.select %20, %26, %27 : vector<8x128xi1>, vector<8x128xf32>
    %29 = arith.addf %25, %28 : vector<8x128xf32>
    %30 = tpu.reciprocal %29 {approx = true} : vector<8x128xf32> -> vector<8x128xf32>
    %31 = arith.mulf %24, %30 : vector<8x128xf32>
    %32 = arith.mulf %12, %17 : vector<8x128xf32>
    %c1_i32 = arith.constant 1 : i32
    %33 = vector.broadcast %c1_i32 : i32 to vector<8x128xi32>
    %34 = arith.cmpi eq, %0, %33 : vector<8x128xi32>
    %cst_11 = arith.constant 1.000000e+00 : f32
    %35 = vector.broadcast %cst_11 : f32 to vector<8x128xf32>
    %36 = arith.addf %32, %35 : vector<8x128xf32>
    %cst_12 = arith.constant 1.000000e+00 : f32
    %37 = vector.broadcast %cst_12 : f32 to vector<8x128xf32>
    %38 = arith.select %34, %36, %37 : vector<8x128xi1>, vector<8x128xf32>
    %39 = arith.mulf %32, %32 : vector<8x128xf32>
    %cst_13 = arith.constant 2.000000e+00 : f32
    %cst_14 = arith.constant 1.000000e+00 : f32
    %40 = vector.broadcast %cst_13 : f32 to vector<8x128xf32>
    %41 = vector.broadcast %cst_14 : f32 to vector<8x128xf32>
    %42 = arith.select %34, %40, %41 : vector<8x128xi1>, vector<8x128xf32>
    %43 = arith.addf %39, %42 : vector<8x128xf32>
    %44 = tpu.reciprocal %43 {approx = true} : vector<8x128xf32> -> vector<8x128xf32>
    %45 = arith.mulf %38, %44 : vector<8x128xf32>
    %46 = arith.addf %31, %45 : vector<8x128xf32>
    %47 = arith.mulf %14, %17 : vector<8x128xf32>
    %c2_i32 = arith.constant 2 : i32
    %48 = vector.broadcast %c2_i32 : i32 to vector<8x128xi32>
    %49 = arith.cmpi eq, %0, %48 : vector<8x128xi32>
    %cst_15 = arith.constant 1.000000e+00 : f32
    %50 = vector.broadcast %cst_15 : f32 to vector<8x128xf32>
    %51 = arith.addf %47, %50 : vector<8x128xf32>
    %cst_16 = arith.constant 1.000000e+00 : f32
    %52 = vector.broadcast %cst_16 : f32 to vector<8x128xf32>
    %53 = arith.select %49, %51, %52 : vector<8x128xi1>, vector<8x128xf32>
    %54 = arith.mulf %47, %47 : vector<8x128xf32>
    %cst_17 = arith.constant 2.000000e+00 : f32
    %cst_18 = arith.constant 1.000000e+00 : f32
    %55 = vector.broadcast %cst_17 : f32 to vector<8x128xf32>
    %56 = vector.broadcast %cst_18 : f32 to vector<8x128xf32>
    %57 = arith.select %49, %55, %56 : vector<8x128xi1>, vector<8x128xf32>
    %58 = arith.addf %54, %57 : vector<8x128xf32>
    %59 = tpu.reciprocal %58 {approx = true} : vector<8x128xf32> -> vector<8x128xf32>
    %60 = arith.mulf %53, %59 : vector<8x128xf32>
    %61 = arith.addf %46, %60 : vector<8x128xf32>
    %cst_19 = arith.constant 3.000000e+00 : f32
    %62 = vector.broadcast %cst_19 : f32 to vector<8x128xf32>
    %63 = arith.subf %62, %61 : vector<8x128xf32>
    %c1024_i32 = arith.constant 1024 : i32
    %64 = arith.muli %arg0, %c1024_i32 : i32
    %c1024_i32_20 = arith.constant 1024 : i32
    %65 = arith.addi %64, %c1024_i32_20 : i32
    %c8_i32 = arith.constant 8 : i32
    %66 = arith.cmpi sgt, %65, %c8_i32 : i32
    %67 = arith.extui %66 : i1 to i32
    %c0_i32_21 = arith.constant 0 : i32
    %68 = arith.cmpi ne, %67, %c0_i32_21 : i32
    scf.if %68 {
      %72 = tpu.iota {dimensions = array<i32: 0>} : vector<8x128xi32>
      %73 = tpu.iota {dimensions = array<i32: 1>} : vector<8x128xi32>
      %c128_i32 = arith.constant 128 : i32
      %74 = vector.broadcast %c128_i32 : i32 to vector<8x128xi32>
      %75 = arith.muli %72, %74 : vector<8x128xi32>
      %76 = vector.broadcast %64 : i32 to vector<8x128xi32>
      %77 = arith.addi %76, %75 : vector<8x128xi32>
      %78 = arith.addi %77, %73 : vector<8x128xi32>
      %c8_i32_23 = arith.constant 8 : i32
      %79 = vector.broadcast %c8_i32_23 : i32 to vector<8x128xi32>
      %80 = arith.cmpi slt, %78, %79 : vector<8x128xi32>
      %cst_24 = arith.constant 0.000000e+00 : f32
      %81 = vector.broadcast %cst_24 : f32 to vector<8x128xf32>
      %82 = arith.select %80, %63, %81 : vector<8x128xi1>, vector<8x128xf32>
      %83 = vector.shape_cast %82 : vector<8x128xf32> to vector<1x8x128xf32>
      %cst_25 = arith.constant dense<0.000000e+00> : vector<8x128xf32>
      %84 = vector.multi_reduction <add>, %83, %cst_25 [0] : vector<1x8x128xf32> to vector<8x128xf32>
      %85 = vector.shape_cast %84 : vector<8x128xf32> to vector<1x8x128xf32>
      %c0_26 = arith.constant 0 : index
      %c0_27 = arith.constant 0 : index
      %c0_28 = arith.constant 0 : index
      %86 = vector.load %arg3[%c0_26, %c0_27, %c0_28] : memref<1x8x128xf32, #tpu.memory_space<vmem>>, vector<1x8x128xf32>
      tpu.vector_store %arg3[%c0_26, %c0_27, %c0_28], %85 {strides = array<i32>} : memref<1x8x128xf32, #tpu.memory_space<vmem>>, vector<1x8x128xf32>,
    } else {
    }
    %true = arith.constant true
    %69 = arith.xori %66, %true : i1
    %70 = arith.extui %69 : i1 to i32
    %c0_i32_22 = arith.constant 0 : i32
    %71 = arith.cmpi ne, %70, %c0_i32_22 : i32
    scf.if %71 {
      %72 = vector.shape_cast %63 : vector<8x128xf32> to vector<1x8x128xf32>
      %cst_23 = arith.constant dense<0.000000e+00> : vector<8x128xf32>
      %73 = vector.multi_reduction <add>, %72, %cst_23 [0] : vector<1x8x128xf32> to vector<8x128xf32>
      %74 = vector.shape_cast %73 : vector<8x128xf32> to vector<1x8x128xf32>
      %c0_24 = arith.constant 0 : index
      %c0_25 = arith.constant 0 : index
      %c0_26 = arith.constant 0 : index
      %75 = vector.load %arg3[%c0_24, %c0_25, %c0_26] : memref<1x8x128xf32, #tpu.memory_space<vmem>>, vector<1x8x128xf32>
      tpu.vector_store %arg3[%c0_24, %c0_25, %c0_26], %74 {strides = array<i32>} : memref<1x8x128xf32, #tpu.memory_space<vmem>>, vector<1x8x128xf32>,
    } else {
    }
    return
  }
  func.func @transform_0(%arg0: i32) -> (i32, i32, i32) {
    %c0_i32 = arith.constant 0 : i32
    %c0_i32_0 = arith.constant 0 : i32
    %c0_i32_1 = arith.constant 0 : i32
    return %c0_i32, %arg0, %c0_i32_0 : i32, i32, i32
  }
  func.func @transform_1(%arg0: i32) -> (i32, i32) {
    %c0_i32 = arith.constant 0 : i32
    %c0_i32_0 = arith.constant 0 : i32
    return %arg0, %c0_i32 : i32, i32
  }
  func.func @transform_2(%arg0: i32) -> (i32, i32, i32) {
    %c0_i32 = arith.constant 0 : i32
    %c0_i32_0 = arith.constant 0 : i32
    %c0_i32_1 = arith.constant 0 : i32
    return %arg0, %c0_i32, %c0_i32_0 : i32, i32, i32
  }
}

</mosaic_0001>

<bundles_post_ra>
// kernel: tpu_custom_call.1
= control target key start
LH: loop header
LB: loop body
LE: loop exit
PB: predicated region body
PF: predicated region fallthrough
CT: control target
= control target key end

     0   :  { %7 = vsyncpa [#allocation3], 0  ;;  %s268_s0 = inlined_call_operand.hbm [shape: f32[3,8,128], index: 0, kind: input, shape index: {}]   ;;  %s269_s1 = inlined_call_operand.hbm [shape: s32[8,128], index: 1, kind: input, shape index: {}]   ;;  %s270_s2 = inlined_call_operand.hbm [shape: f32[1,8,128], index: 2, kind: output, shape index: {}]  }
   0x1   :  { %8 = vsyncpa [#allocation6], 0 }
   0x2   :  { %9 = vsyncpa [#allocation4], 0  ;;  %s14_s11 = sshll.u32 %s268_s0, 4  ;;  %s232_s12 = smov [#allocation2]   ;;  %s15_s11 = int_to_ptr.hbm [resolvable:$true] %s14_s11 }
   0x3   :  { %s16_s13 = sshll.u32 %s232_s12, 4  ;;  %s28_s16 = sshll.u32 %s269_s1, 4  ;;  %s17_s13 = int_to_ptr.vmem [resolvable:$true] %s16_s13  ;;  %s29_s16 = int_to_ptr.hbm [resolvable:$true] %s28_s16 }
   0x4   :  { %s233_s17 = smov 128   ;;  %s234_s18 = smov 8  }
   0x5   :  { %22 = dma.hbm_to_vmem [thread:$0]  %s15_s11, 384, %s17_s13, [#allocation3], %s233_s17, %s233_s17, %s234_s18  }
   0x6   :  { %s235_s19 = smov [#allocation5]  }
   0x7   :  { %s30_s20 = sshll.u32 %s235_s19, 4  ;;  %s31_s20 = int_to_ptr.vmem [resolvable:$true] %s30_s20 }
   0x8   :  { %33 = dma.hbm_to_vmem [thread:$0]  %s29_s16, 128, %s31_s20, [#allocation6]  }
   0x9   :  { %226 = dma.done.wait [#allocation3], 384  }
   0xa   :  { %227 = vsyncadd [#allocation3], 4294966912 }
   0xb   :  { %228 = dma.done.wait [#allocation6], 128  }
   0xc   :  { %229 = vsyncadd [#allocation6], 4294967168  ;;  %v43_v0 = vld [vmem:[#allocation2] sm:$0xff]  ;;  %v45_v1 = vld [vmem:[#allocation2 + $0x8] sm:$0xff]  ;;  %v236_v21 = vmov 1.0   ;;  %v98_v28 = vlaneseq  ;;  %s237_s0 = smov [#allocation7]  }
   0xd   :  { %v47_v2 = vld [vmem:[#allocation2 + $0x10] sm:$0xff]  ;;  %v48_v3 = vmax.f32 %v43_v0, %v45_v1  ;;  %v42_v16 = vld [vmem:[#allocation5] sm:$0xff]  ;;  %s121_s1 = sshll.u32 %s237_s0, 4  ;;  %s123_s23 = sshll.u32 %s270_s2, 4  ;;  %s122_s1 = int_to_ptr.vmem [resolvable:$true] %s121_s1  ;;  %s124_s23 = int_to_ptr.hbm [resolvable:$true] %s123_s23 }
   0xe   :  { %vm63_vm0 = vcmp.eq.s32.totalorder %v42_v16, 0  ;;  %vm72_vm1 = vcmp.eq.s32.totalorder %v42_v16, 1  ;;  %vm82_vm2 = vcmp.eq.s32.totalorder %v42_v16, 2  ;;  %v99_v34 = vshrl.u32 %v98_v28, 7 }
   0xf   :  { %v49_v4 = vmax.f32 %v48_v3, %v47_v2  ;;  %v67_v22 = vsel %vm63_vm0, 2.0, %v236_v21  ;;  %v76_v23 = vsel %vm72_vm1, 2.0, %v236_v21  ;;  %v86_v26 = vsel %vm82_vm2, 2.0, %v236_v21 }
  0x10   :  { %v101_v38 = vand.u32 127, %v98_v28  ;;  %v102_v39 = vmul.u32 128, %v99_v34 }
  0x11   :  { %v50_v5 = vsub.f32 %v43_v0, %v49_v4  ;;  %v53_v6 = vsub.f32 %v45_v1, %v49_v4  ;;  %v56_v7 = vsub.f32 %v47_v2, %v49_v4 }
  0x12   :  { %v105_v47 = vadd.s32 %v102_v39, %v101_v38 }
  0x13   :  { %v51_v8 = vmul.f32 1.442695, %v50_v5  ;;  %v54_v9 = vmul.f32 1.442695, %v53_v6  ;;  %v57_v10 = vmul.f32 1.442695, %v56_v7 }
  0x14   :  { %vm106_vm3 = vcmp.lt.s32.totalorder %v105_v47, 8 }
  0x15   :  { %140 = vpow2.f32 %v51_v8 }
  0x16   :  { %142 = vpow2.f32 %v54_v9 }
  0x17   :  { %144 = vpow2.f32 %v57_v10 }
  0x1b   :  { %v141_v11 = vpop.eup %140 }
  0x1c   :  { %v143_v12 = vpop.eup %142 }
  0x1d   :  { %v145_v13 = vpop.eup %144  ;;  %v59_v14 = vadd.f32 %v143_v12, %v141_v11 }
  0x1f   :  { %v60_v15 = vadd.f32 %v145_v13, %v59_v14 }
  0x21   :  { %146 = vrcp.f32 %v60_v15 }
  0x27   :  { %v147_v17 = vpop.eup %146 }
  0x28   :  { %v62_v18 = vmul.f32 %v147_v17, %v141_v11  ;;  %v71_v19 = vmul.f32 %v147_v17, %v143_v12  ;;  %v81_v20 = vmul.f32 %v147_v17, %v145_v13 }
  0x2a   :  { %v66_v24 = vmul.f32 %v62_v18, %v62_v18  ;;  %v75_v25 = vmul.f32 %v71_v19, %v71_v19  ;;  %v85_v27 = vmul.f32 %v81_v20, %v81_v20  ;;  %v64_v32 = vadd.f32 1.0, %v62_v18 }
  0x2b   :  { %v73_v33 = vadd.f32 1.0, %v71_v19  ;;  %v83_v35 = vadd.f32 1.0, %v81_v20 }
  0x2c   :  { %v68_v29 = vadd.f32 %v67_v22, %v66_v24  ;;  %v77_v30 = vadd.f32 %v76_v23, %v75_v25  ;;  %v87_v31 = vadd.f32 %v86_v26, %v85_v27  ;;  %v65_v36 = vsel %vm63_vm0, %v64_v32, 1.0 }
  0x2d   :  { %v74_v37 = vsel %vm72_vm1, %v73_v33, 1.0  ;;  %v84_v41 = vsel %vm82_vm2, %v83_v35, 1.0 }
  0x2e   :  { %148 = vrcp.f32 %v68_v29 }
  0x2f   :  { %150 = vrcp.f32 %v77_v30 }
  0x30   :  { %152 = vrcp.f32 %v87_v31 }
  0x34   :  { %v149_v40 = vpop.eup %148 }
  0x35   :  { %v151_v42 = vpop.eup %150  ;;  %v70_v43 = vmul.f32 %v149_v40, %v65_v36 }
  0x36   :  { %v153_v44 = vpop.eup %152  ;;  %v79_v45 = vmul.f32 %v151_v42, %v74_v37 }
  0x37   :  { %v89_v46 = vmul.f32 %v153_v44, %v84_v41 }
  0x38   :  { %v80_v48 = vadd.f32 %v79_v45, %v70_v43 }
  0x3a   :  { %v90_v49 = vadd.f32 %v89_v46, %v80_v48 }
  0x3c   :  { %v91_v50 = vsub.f32 3.0, %v90_v49 }
  0x3e   :  { %v107_v51 = vsel %vm106_vm3, %v91_v50, 0.0 }
  0x3f   :  { %109 = vst [vmem:[#allocation7] sm:$0xff] %v107_v51 }
  0x40   :  { %126 = dma.vmem_to_hbm [thread:$0]  %s122_s1, 128, %s124_s23, [#allocation4]  }
  0x41   :  { %230 = dma.done.wait [#allocation4], 128  }
  0x42   :  { %231 = vsyncadd [#allocation4], 4294967168 }
  0x43   :  { %131 = vsyncpa [#allocation3], 1 }
  0x44   :  { %132 = vsyncpa [#allocation6], 1 }
  0x45   :  { %133 = vsyncpa [#allocation4], 1 }

</bundles_post_ra>
